<compile_context>
chip_gen: v5e
topology: v5e:2x2
jax: 0.10.0
libtpu: 0.0.40
codegen_flags: <defaults>
</compile_context>

<pallas_src>
import functools

import jax
import jax.numpy as jnp
from jax.experimental import pallas as pl
from jax.experimental.pallas import tpu as pltpu


def _round_up(x: int, m: int) -> int:
    return (x + m - 1) // m * m


def _choose_tm(n: int, cap: int = 512) -> int:
    """Row-tile size: >=2 tiles when n > 8, minimal padding, <= cap rows."""
    n = max(int(n), 1)
    if n <= 8:
        return 8
    num_tiles = max(2, -(-n // cap))
    tm = -(-n // num_tiles)
    return _round_up(tm, 8)


def _embed_fc_kernel(x_ref, w1_ref, b1_ref, w2_ref, b2_ref, o_ref, *,
                     approximate_gelu: bool):
    # Cast x to the weight compute dtype on the VPU (avoids a wrapper pass).
    x = x_ref[...].astype(w1_ref.dtype)
    # First linear: (TM, D_in) @ (D_in, E) with f32 MXU accumulation.
    h = jnp.dot(x, w1_ref[...], preferred_element_type=jnp.float32)
    h = h + b1_ref[...]  # biases are f32
    if approximate_gelu:
        # tanh-approx GELU: tanh goes to the EUP slot (VALU relief).
        c = jnp.float32(0.7978845608028654)  # sqrt(2/pi)
        h = 0.5 * h * (1.0 + jnp.tanh(c * (h + 0.044715 * h * h * h)))
    else:
        # Exact (erf-based) GELU, matching PyTorch nn.GELU() default.
        h = 0.5 * h * (1.0 + jax.lax.erf(h * jnp.float32(0.7071067811865476)))
    # Second linear: (TM, E) @ (E, E) with f32 MXU accumulation.
    o = jnp.dot(h.astype(w2_ref.dtype), w2_ref[...],
                preferred_element_type=jnp.float32)
    o = o + b2_ref[...]
    o_ref[...] = o.astype(o_ref.dtype)


def prepare_embed_fc_params(w1, b1, w2, b2, compute_dtype=jnp.bfloat16):
    """One-time parameter prep: cast weights and pad emb_dim to 128 lanes.

    w1: (input_dim, emb_dim)  (i.e. PyTorch weight already transposed)
    w2: (emb_dim, emb_dim)
    b1, b2: (emb_dim,) or (1, emb_dim)
    """
    input_dim, emb_dim = w1.shape
    assert w2.shape == (emb_dim, emb_dim)
    d_emb = _round_up(emb_dim, 128)
    pe = d_emb - emb_dim
    cdt = jnp.dtype(compute_dtype)
    w1p = jnp.pad(w1.astype(cdt), ((0, 0), (0, pe)))
    w2p = jnp.pad(w2.astype(cdt), ((0, pe), (0, pe)))
    b1p = jnp.pad(b1.reshape(1, -1).astype(jnp.float32), ((0, 0), (0, pe)))
    b2p = jnp.pad(b2.reshape(1, -1).astype(jnp.float32), ((0, 0), (0, pe)))
    return dict(w1=w1p, b1=b1p, w2=w2p, b2=b2p,
                input_dim=input_dim, emb_dim=emb_dim)


def embed_fc_apply(params, x, *, out_dtype=jnp.float32,
                   approximate_gelu=False, tm_cap=512):
    """x: (..., input_dim) -> (N, emb_dim), N = prod(leading dims)."""
    input_dim = params["input_dim"]
    emb_dim = params["emb_dim"]
    w1p, b1p, w2p, b2p = params["w1"], params["b1"], params["w2"], params["b2"]
    d_emb = w1p.shape[1]

    x2d = x.reshape(-1, input_dim)  # PyTorch: x.view(-1, input_dim)
    n = x2d.shape[0]
    tm = _choose_tm(n, tm_cap)
    grid = (pl.cdiv(n, tm),)

    x_item = jnp.dtype(x2d.dtype).itemsize
    c_item = jnp.dtype(w1p.dtype).itemsize
    o_item = jnp.dtype(out_dtype).itemsize

    # VMEM budget: double-buffered x / out tiles, resident weights (assume two
    # buffers to be safe), biases, f32 intermediates; 2x headroom, 32 MiB
    # floor (>= default scoped limit everywhere), 64 MiB cap (v7x physical).
    est = (2 * tm * input_dim * x_item
           + 2 * tm * d_emb * o_item
           + 2 * (input_dim * d_emb + d_emb * d_emb) * c_item
           + 4 * d_emb * 4
           + 4 * tm * d_emb * 4)
    vmem_limit = int(min(64 << 20, max(32 << 20, 2 * est)))

    flops = 2 * n * (input_dim * emb_dim + emb_dim * emb_dim)
    bytes_accessed = (x2d.size * x_item
                      + (w1p.size + w2p.size) * c_item
                      + (b1p.size + b2p.size) * 4
                      + n * emb_dim * o_item)

    kernel = functools.partial(_embed_fc_kernel,
                               approximate_gelu=approximate_gelu)

    out = pl.pallas_call(
        kernel,
        out_shape=jax.ShapeDtypeStruct((n, d_emb), out_dtype),
        grid=grid,
        in_specs=[
            # Row-tiled activations: new tile each grid step (pipelined).
            # Last dim == full input_dim (no feature padding needed).
            pl.BlockSpec((tm, input_dim), lambda i: (i, 0)),
            # Weights / biases: constant block index -> resident in VMEM.
            pl.BlockSpec((input_dim, d_emb), lambda i: (0, 0)),
            pl.BlockSpec((1, d_emb), lambda i: (0, 0)),
            pl.BlockSpec((d_emb, d_emb), lambda i: (0, 0)),
            pl.BlockSpec((1, d_emb), lambda i: (0, 0)),
        ],
        out_specs=pl.BlockSpec((tm, d_emb), lambda i: (i, 0)),
        compiler_params=pltpu.CompilerParams(
            dimension_semantics=("parallel",),
            vmem_limit_bytes=vmem_limit),
        cost_estimate=pl.CostEstimate(
            flops=flops,
            transcendentals=n * emb_dim,
            bytes_accessed=bytes_accessed),
    )(x2d, w1p, b1p, w2p, b2p)

    if d_emb != emb_dim:
        out = out[:, :emb_dim]
    return out


def embed_fc(x, w1, b1, w2, b2, *, compute_dtype=jnp.bfloat16, **kwargs):
    """Convenience one-shot wrapper (prep + apply)."""
    params = prepare_embed_fc_params(w1, b1, w2, b2, compute_dtype)
    return embed_fc_apply(params, x, **kwargs)


def reference_embed_fc(x, w1, b1, w2, b2):
    x2d = x.reshape(-1, w1.shape[0]).astype(jnp.float32)
    h = x2d @ w1 + b1.reshape(1, -1)
    h = jax.nn.gelu(h, approximate=False)
    return h @ w2 + b2.reshape(1, -1)


if __name__ == "__main__":
    key = jax.random.PRNGKey(0)
    k_x, k_w1, k_b1, k_w2, k_b2, k_x2 = jax.random.split(key, 6)

    # Small shapes consistent with EmbedFC usage in the diffusion model.
    input_dim, emb_dim = 32, 64

    lim1 = 1.0 / jnp.sqrt(input_dim)
    lim2 = 1.0 / jnp.sqrt(emb_dim)
    w1 = jax.random.uniform(k_w1, (input_dim, emb_dim), jnp.float32, -lim1, lim1)
    b1 = jax.random.uniform(k_b1, (1, emb_dim), jnp.float32, -lim1, lim1)
    w2 = jax.random.uniform(k_w2, (emb_dim, emb_dim), jnp.float32, -lim2, lim2)
    b2 = jax.random.uniform(k_b2, (1, emb_dim), jnp.float32, -lim2, lim2)

    # Extra leading dims exercise x.view(-1, input_dim) flatten (N = 8).
    x = jax.random.normal(k_x, (2, 4, input_dim), jnp.float32)
    ref = reference_embed_fc(x, w1, b1, w2, b2)

    # f32 path (exact parity with the PyTorch / XLA reference).
    params_f32 = prepare_embed_fc_params(w1, b1, w2, b2,
                                         compute_dtype=jnp.float32)
    out_f32 = jax.block_until_ready(embed_fc_apply(params_f32, x))
    assert out_f32.shape == (8, emb_dim)
    assert jnp.allclose(out_f32, ref, atol=1e-5, rtol=1e-5), "f32 mismatch"

    # Default bf16 MXU path (f32 accumulate / bias / GELU / output).
    params_bf16 = prepare_embed_fc_params(w1, b1, w2, b2)
    out_bf16 = jax.block_until_ready(embed_fc_apply(params_bf16, x))
    assert out_bf16.shape == (8, emb_dim)
    assert jnp.allclose(out_bf16, ref, atol=5e-2, rtol=5e-2), "bf16 mismatch"

    # Ragged N exercises the multi-step grid + masked edge block (N = 20).
    x2 = jax.random.normal(k_x2, (20, input_dim), jnp.float32)
    ref2 = reference_embed_fc(x2, w1, b1, w2, b2)
    out2 = jax.block_until_ready(embed_fc_apply(params_f32, x2))
    assert out2.shape == (20, emb_dim)
    assert jnp.allclose(out2, ref2, atol=1e-5, rtol=1e-5), "ragged-N mismatch"

    print("KERNEL_OK")
</pallas_src>

<mosaic_0001>
module attributes {stable_mosaic.version = 11 : i64} {
  func.func @_embed_fc_kernel(%arg0: i32, %arg1: memref<8x32xf32, #tpu.memory_space<vmem>>, %arg2: memref<32x128xf32, #tpu.memory_space<vmem>>, %arg3: memref<1x128xf32, #tpu.memory_space<vmem>>, %arg4: memref<128x128xf32, #tpu.memory_space<vmem>>, %arg5: memref<1x128xf32, #tpu.memory_space<vmem>>, %arg6: memref<8x128xf32, #tpu.memory_space<vmem>>) attributes {dimension_semantics = [#tpu.dimension_semantics<parallel>], iteration_bounds = array<i64: 1>, scalar_prefetch = 0 : i64, scratch_operands = 0 : i64, tpu.core_type = #tpu.core_type<tc>, window_params = [{transform_indices = @transform_0, window_bounds = array<i64: 8, 32>}, {pipeline_mode = #tpu.pipeline_mode<synchronous>, transform_indices = @transform_1, window_bounds = array<i64: 32, 128>}, {pipeline_mode = #tpu.pipeline_mode<synchronous>, transform_indices = @transform_2, window_bounds = array<i64: 1, 128>}, {pipeline_mode = #tpu.pipeline_mode<synchronous>, transform_indices = @transform_3, window_bounds = array<i64: 128, 128>}, {pipeline_mode = #tpu.pipeline_mode<synchronous>, transform_indices = @transform_4, window_bounds = array<i64: 1, 128>}, {transform_indices = @transform_5, window_bounds = array<i64: 8, 128>}]} {
    %c0 = arith.constant 0 : index
    %c0_0 = arith.constant 0 : index
    %0 = vector.load %arg1[%c0, %c0_0] : memref<8x32xf32, #tpu.memory_space<vmem>>, vector<8x32xf32>
    %c0_1 = arith.constant 0 : index
    %c0_2 = arith.constant 0 : index
    %1 = vector.load %arg2[%c0_1, %c0_2] : memref<32x128xf32, #tpu.memory_space<vmem>>, vector<32x128xf32>
    %cst = arith.constant dense<0.000000e+00> : vector<8x128xf32>
    %2 = tpu.matmul %0, %1, %cst {dimension_numbers = #tpu.dot_dimension_numbers<[1], [0], [0], [1], [0, 0, 1, 1], [], []>} : vector<8x32xf32>, vector<32x128xf32>, vector<8x128xf32> -> vector<8x128xf32>
    %c0_3 = arith.constant 0 : index
    %c0_4 = arith.constant 0 : index
    %3 = vector.load %arg3[%c0_3, %c0_4] : memref<1x128xf32, #tpu.memory_space<vmem>>, vector<1x128xf32>
    %4 = vector.broadcast %3 : vector<1x128xf32> to vector<8x128xf32>
    %5 = arith.addf %2, %4 : vector<8x128xf32>
    %cst_5 = arith.constant 5.000000e-01 : f32
    %6 = vector.broadcast %cst_5 : f32 to vector<8x128xf32>
    %7 = arith.mulf %6, %5 : vector<8x128xf32>
    %cst_6 = arith.constant 0.707106769 : f32
    %8 = vector.broadcast %cst_6 : f32 to vector<8x128xf32>
    %9 = arith.mulf %5, %8 : vector<8x128xf32>
    %10 = math.erf %9 : vector<8x128xf32>
    %cst_7 = arith.constant 1.000000e+00 : f32
    %11 = vector.broadcast %cst_7 : f32 to vector<8x128xf32>
    %12 = arith.addf %11, %10 : vector<8x128xf32>
    %13 = arith.mulf %7, %12 : vector<8x128xf32>
    %c0_8 = arith.constant 0 : index
    %c0_9 = arith.constant 0 : index
    %14 = vector.load %arg4[%c0_8, %c0_9] : memref<128x128xf32, #tpu.memory_space<vmem>>, vector<128x128xf32>
    %cst_10 = arith.constant dense<0.000000e+00> : vector<8x128xf32>
    %15 = tpu.matmul %13, %14, %cst_10 {dimension_numbers = #tpu.dot_dimension_numbers<[1], [0], [0], [1], [0, 0, 1, 1], [], []>} : vector<8x128xf32>, vector<128x128xf32>, vector<8x128xf32> -> vector<8x128xf32>
    %c0_11 = arith.constant 0 : index
    %c0_12 = arith.constant 0 : index
    %16 = vector.load %arg5[%c0_11, %c0_12] : memref<1x128xf32, #tpu.memory_space<vmem>>, vector<1x128xf32>
    %17 = vector.broadcast %16 : vector<1x128xf32> to vector<8x128xf32>
    %18 = arith.addf %15, %17 : vector<8x128xf32>
    %c0_13 = arith.constant 0 : index
    %c0_14 = arith.constant 0 : index
    %19 = vector.load %arg6[%c0_13, %c0_14] : memref<8x128xf32, #tpu.memory_space<vmem>>, vector<8x128xf32>
    tpu.vector_store %arg6[%c0_13, %c0_14], %18 {strides = array<i32>} : memref<8x128xf32, #tpu.memory_space<vmem>>, vector<8x128xf32>,
    return
  }
  func.func @transform_0(%arg0: i32) -> (i32, i32) {
    %c0_i32 = arith.constant 0 : i32
    %c0_i32_0 = arith.constant 0 : i32
    return %arg0, %c0_i32 : i32, i32
  }
  func.func @transform_1(%arg0: i32) -> (i32, i32) {
    %c0_i32 = arith.constant 0 : i32
    %c0_i32_0 = arith.constant 0 : i32
    %c0_i32_1 = arith.constant 0 : i32
    return %c0_i32, %c0_i32_0 : i32, i32
  }
  func.func @transform_2(%arg0: i32) -> (i32, i32) {
    %c0_i32 = arith.constant 0 : i32
    %c0_i32_0 = arith.constant 0 : i32
    %c0_i32_1 = arith.constant 0 : i32
    return %c0_i32, %c0_i32_0 : i32, i32
  }
  func.func @transform_3(%arg0: i32) -> (i32, i32) {
    %c0_i32 = arith.constant 0 : i32
    %c0_i32_0 = arith.constant 0 : i32
    %c0_i32_1 = arith.constant 0 : i32
    return %c0_i32, %c0_i32_0 : i32, i32
  }
  func.func @transform_4(%arg0: i32) -> (i32, i32) {
    %c0_i32 = arith.constant 0 : i32
    %c0_i32_0 = arith.constant 0 : i32
    %c0_i32_1 = arith.constant 0 : i32
    return %c0_i32, %c0_i32_0 : i32, i32
  }
  func.func @transform_5(%arg0: i32) -> (i32, i32) {
    %c0_i32 = arith.constant 0 : i32
    %c0_i32_0 = arith.constant 0 : i32
    return %arg0, %c0_i32 : i32, i32
  }
}

</mosaic_0001>

<bundles_post_ra>
// kernel: tpu_custom_call.1
= control target key start
LH: loop header
LB: loop body
LE: loop exit
PB: predicated region body
PF: predicated region fallthrough
CT: control target
= control target key end

     0   :  { %10 = vsyncpa [#allocation3], 0  ;;  %s370_s0 = inlined_call_operand.hbm [shape: f32[8,32], index: 0, kind: input, shape index: {}]   ;;  %s371_s1 = inlined_call_operand.hbm [shape: f32[32,128], index: 1, kind: input, shape index: {}]   ;;  %s372_s2 = inlined_call_operand.vmem [shape: f32[1,128], index: 2, kind: input, shape index: {}]   ;;  %s373_s3 = inlined_call_operand.hbm [shape: f32[128,128], index: 3, kind: input, shape index: {}]   ;;  %s374_s4 = inlined_call_operand.vmem [shape: f32[1,128], index: 4, kind: input, shape index: {}]   ;;  %s375_s5 = inlined_call_operand.hbm [shape: f32[8,128], index: 5, kind: output, shape index: {}]  }
   0x1   :  { %11 = vsyncpa [#allocation6], 0  ;;  %s28_s20 = sshll.u32 %s371_s1, 4  ;;  %s29_s20 = int_to_ptr.hbm [resolvable:$true] %s28_s20 }
   0x2   :  { %12 = vsyncpa [#allocation4], 0  ;;  %s316_s21 = smov [#allocation5]   ;;  %s18_s25 = sshll.u32 %s370_s0, 4  ;;  %s19_s25 = int_to_ptr.hbm [resolvable:$true] %s18_s25 }
   0x3   :  { %s30_s22 = sshll.u32 %s316_s21, 4  ;;  %s317_s26 = smov 128   ;;  %s31_s22 = int_to_ptr.vmem [resolvable:$true] %s30_s22 }
   0x4   :  { %s318_s27 = smov 8   ;;  %s319_s28 = smov [#allocation2]  }
   0x5   :  { %36 = dma.hbm_to_vmem [thread:$0]  %s29_s20, 512, %s31_s22, [#allocation6], %s317_s26, %s317_s26, %s318_s27  }
   0x6   :  { %s20_s29 = sshll.u32 %s319_s28, 4  ;;  %s43_s7 = sshll.u32 %s373_s3, 4  ;;  %s21_s29 = int_to_ptr.vmem [resolvable:$true] %s20_s29  ;;  %s44_s7 = int_to_ptr.hbm [resolvable:$true] %s43_s7 }
   0x7   :  { %23 = dma.hbm_to_vmem [thread:$0]  %s19_s25, 128, %s21_s29, [#allocation3]  }
   0x8   :  { %s320_s1 = smov [#allocation7]  }
   0x9   :  { %s45_s8 = sshll.u32 %s320_s1, 4  ;;  %s46_s8 = int_to_ptr.vmem [resolvable:$true] %s45_s8 }
   0xa   :  { %51 = dma.hbm_to_vmem [thread:$0]  %s44_s7, 2048, %s46_s8, [#allocation6], %s317_s26, %s317_s26, %s318_s27  }
   0xb   :  { %310 = dma.done.wait [#allocation3], 128  }
   0xc   :  { %311 = vsyncadd [#allocation3], 4294967168 }
   0xd   :  { %312 = dma.done.wait [#allocation6], 2560  }
   0xe   :  { %313 = vsyncadd [#allocation6], 4294964736  ;;  %v70_v0 = vld [vmem:[#allocation5 + $0x18] sm:$0xff]  ;;  %v69_v1 = vld [vmem:[#allocation5 + $0x10] sm:$0xff]  ;;  %vm75_vm0 = vcmask 261120   ;;  %s321_s10 = smov [#allocation8]  }
   0xf   :  { %91 = vmatpush.msra.mxu0 %v70_v0  ;;  %v68_v2 = vld [vmem:[#allocation5 + $0x8] sm:$0xff]  ;;  %v67_v3 = vld [vmem:[#allocation5] sm:$0xff]  ;;  %v66_v4 = vld [vmem:[#allocation2] sm:$0xff]  ;;  %s189_s11 = sshll.u32 %s321_s10, 4  ;;  %s191_s14 = sshll.u32 %s375_s5, 4  ;;  %s190_s11 = int_to_ptr.vmem [resolvable:$true] %s189_s11  ;;  %s192_s14 = int_to_ptr.hbm [resolvable:$true] %s191_s14 }
  0x10   :  { %v158_v5 = vld [vmem:[#allocation7 + $0x78] sm:$0xff]  ;;  %v157_v6 = vld [vmem:[#allocation7 + $0x70] sm:$0xff]  ;;  %v156_v7 = vld [vmem:[#allocation7 + $0x68] sm:$0xff] }
  0x11   :  { %92 = vmatpush.msra.mxu0 %v69_v1  ;;  %163 = vmatpush.msra.mxu1 %v158_v5  ;;  %v155_v8 = vld [vmem:[#allocation7 + $0x60] sm:$0xff]  ;;  %v210_v9 = vld [vmem:[%s372_s2] ss:$0 sm:$0xff]  ;;  %v153_v11 = vld [vmem:[#allocation7 + $0x50] sm:$0xff] }
  0x12   :  { %v154_v10 = vld [vmem:[#allocation7 + $0x58] sm:$0xff]  ;;  %v152_v13 = vld [vmem:[#allocation7 + $0x48] sm:$0xff]  ;;  %v151_v15 = vld [vmem:[#allocation7 + $0x40] sm:$0xff] }
  0x13   :  { %93 = vmatpush.msra.mxu0 %v68_v2  ;;  %164 = vmatpush.msra.mxu1 %v157_v6  ;;  %v150_v17 = vld [vmem:[#allocation7 + $0x38] sm:$0xff]  ;;  %v149_v19 = vld [vmem:[#allocation7 + $0x30] sm:$0xff]  ;;  %v148_v21 = vld [vmem:[#allocation7 + $0x28] sm:$0xff] }
  0x14   :  { %v147_v24 = vld [vmem:[#allocation7 + $0x20] sm:$0xff]  ;;  %v146_v27 = vld [vmem:[#allocation7 + $0x18] sm:$0xff]  ;;  %v145_v30 = vld [vmem:[#allocation7 + $0x10] sm:$0xff] }
  0x15   :  { %94 = vmatpush.msra.mxu0 %v67_v3  ;;  %165 = vmatpush.msra.mxu1 %v156_v7  ;;  %v144_v33 = vld [vmem:[#allocation7 + $0x8] sm:$0xff]  ;;  %v143_v35 = vld [vmem:[#allocation7] sm:$0xff]  ;;  %v211_v63 = vld [vmem:[%s374_s4] ss:$0 sm:$0xff] }
  0x16   :  { %202 = vmatmul.msk.f32.vlgmr.msra.gmra.mxu0 %vm75_vm0, %v66_v4 }
  0x17   :  { %166 = vmatpush.msra.mxu1 %v155_v8 }
  0x19   :  { %167 = vmatpush.msra.mxu1 %v154_v10 }
  0x1b   :  { %168 = vmatpush.msra.mxu1 %v153_v11 }
  0x1d   :  { %169 = vmatpush.msra.mxu1 %v152_v13 }
  0x1f   :  { %170 = vmatpush.msra.mxu1 %v151_v15 }
  0x21   :  { %171 = vmatpush.msra.mxu1 %v150_v17 }
  0x23   :  { %172 = vmatpush.msra.mxu1 %v149_v19 }
  0x25   :  { %173 = vmatpush.msra.mxu1 %v148_v21 }
  0x27   :  { %174 = vmatpush.msra.mxu1 %v147_v24 }
  0x29   :  { %175 = vmatpush.msra.mxu1 %v146_v27 }
  0x2b   :  { %176 = vmatpush.msra.mxu1 %v145_v30 }
  0x2d   :  { %177 = vmatpush.msra.mxu1 %v144_v33 }
  0x2f   :  { %178 = vmatpush.msra.mxu1 %v143_v35 }
  0x93   :  { %v96_v12 = vpop.f32.mrf.mxu0 }
  0x94   :  { %v97_v14 = vadd.f32 %v210_v9, %v96_v12 }
  0x96   :  { %v100_v16 = vmul.f32 0.70710677, %v97_v14  ;;  %v99_v60 = vmul.f32 0.5, %v97_v14 }
  0x98   :  { %v101_v18 = vmul.f32 %v100_v16, %v100_v16 }
  0x9a   :  { %v102_v20 = vmin.f32 %v101_v18, 16.0 }
  0x9c   :  { %v103_v22 = vmul.f32 2.1237322e-06, %v102_v20  ;;  %v114_v23 = vmul.f32 3.8918573e-05, %v102_v20 }
  0x9e   :  { %v104_v25 = vadd.f32 0.00028619796, %v103_v22  ;;  %v115_v26 = vadd.f32 0.001143296, %v114_v23 }
  0xa0   :  { %v105_v28 = vmul.f32 %v104_v25, %v102_v20  ;;  %v116_v29 = vmul.f32 %v115_v26, %v102_v20 }
  0xa2   :  { %v117_v31 = vadd.f32 0.014752088, %v116_v29  ;;  %v106_v32 = vadd.f32 0.0036580483, %v105_v28 }
  0xa4   :  { %v118_v34 = vmul.f32 %v117_v31, %v102_v20  ;;  %v107_v37 = vmul.f32 %v106_v32, %v102_v20 }
  0xa6   :  { %v119_v36 = vadd.f32 0.112945676, %v118_v34  ;;  %v108_v40 = vadd.f32 0.05243302, %v107_v37 }
  0xa8   :  { %v120_v38 = vmul.f32 %v119_v36, %v102_v20  ;;  %v109_v43 = vmul.f32 %v108_v40, %v102_v20 }
  0xaa   :  { %v121_v39 = vadd.f32 0.4994258, %v120_v38  ;;  %v110_v44 = vadd.f32 0.18741608, %v109_v43 }
  0xac   :  { %v122_v41 = vmul.f32 %v121_v39, %v102_v20  ;;  %v111_v46 = vmul.f32 %v110_v44, %v102_v20 }
  0xae   :  { %v123_v42 = vadd.f32 1.0, %v122_v41  ;;  %v112_v50 = vadd.f32 1.1283791, %v111_v46 }
  0xb0   :  { %212 = vrcp.f32 %v123_v42  ;;  %v135_v49 = vand.u32 2147483648, %v123_v42  ;;  %v133_v52 = vand.u32 2147483647, %v123_v42  ;;  %vm129_vm2 = vweird.f32 %v123_v42 }
  0xb1   :  { %v113_v55 = vmul.f32 %v112_v50, %v100_v16 }
  0xb2   :  { %v136_v54 = vor.u32 1.1754944e-38, %v135_v49  ;;  %vm134_vm4 = vcmp.eq.f32.partialorder %v133_v52, 8.507059e+37 }
  0xb6   :  { %v213_v45 = vpop.eup %212 }
  0xb7   :  { %v125_v47 = vmul.f32 %v213_v45, %v123_v42  ;;  %vm130_vm1 = vweird.f32 %v213_v45 }
  0xb8   :  { %vm131_vm3 = vmor %vm129_vm2, %vm130_vm1 }
  0xb9   :  { %v126_v48 = vsub.f32 1.0, %v125_v47 }
  0xbb   :  { %v127_v51 = vmul.f32 %v213_v45, %v126_v48 }
  0xbd   :  { %v128_v53 = vadd.f32 %v213_v45, %v127_v51 }
  0xbf   :  { %v132_v56 = vsel %vm131_vm3, %v213_v45, %v128_v53 }
  0xc0   :  { %v137_v57 = vsel %vm134_vm4, %v136_v54, %v132_v56 }
  0xc1   :  { %v138_v58 = vmul.f32 %v137_v57, %v113_v55 }
  0xc3   :  { %v203_v59 = vclamps-f32 %v138_v58, 1.0 }
  0xc5   :  { %v141_v61 = vadd.f32 1.0, %v203_v59 }
  0xc7   :  { %v142_v62 = vmul.f32 %v141_v61, %v99_v60 }
  0xc9   :  { %179 = vmatmul.f32.vlgmr.msra.gmra.mxu1 %v142_v62 }
 0x146   :  { %v180_v0 = vpop.f32.mrf.mxu1 }
 0x147   :  { %v181_v1 = vadd.f32 %v211_v63, %v180_v0 }
 0x149   :  { %183 = vst [vmem:[#allocation8] sm:$0xff] %v181_v1 }
 0x14a   :  { %194 = dma.vmem_to_hbm [thread:$0]  %s190_s11, 128, %s192_s14, [#allocation4]  }
 0x14b   :  { %314 = dma.done.wait [#allocation4], 128  }
 0x14c   :  { %315 = vsyncadd [#allocation4], 4294967168 }
 0x14d   :  { %199 = vsyncpa [#allocation3], 1 }
 0x14e   :  { %200 = vsyncpa [#allocation6], 1 }
 0x14f   :  { %201 = vsyncpa [#allocation4], 1 }

</bundles_post_ra>
